<compile_context>
chip_gen: v7x
topology: tpu7x:2x2x1
jax: 0.10.0
libtpu: 0.0.40
codegen_flags: <defaults>
</compile_context>

<pallas_src>
import jax
import jax.numpy as jnp
from jax.experimental import pallas as pl
from jax.experimental.pallas import tpu as pltpu


def _vmem_budget_bytes():
    """~85% of this generation's VMEM capacity, with a safe fallback."""
    try:
        cap = int(pltpu.get_tpu_info().vmem_capacity_bytes)
    except Exception:
        cap = 0
    if cap <= 0:
        cap = 64 * 1024 * 1024  # v7x physical per-TC VMEM: safe everywhere
    return int(0.85 * cap)


def _pick_batch_block(n, img_bytes, weight_bytes, budget):
    """Largest Nb dividing N whose double-buffered in+out blocks fit the
    budget; prefer >=4 grid steps (2 per v7x TensorCore), then >=2, then 1."""
    usable = int(0.9 * budget) - 2 * weight_bytes
    nb_max = max(1, usable // max(1, 4 * img_bytes))
    candidates = [d for d in range(1, n + 1) if n % d == 0 and d <= nb_max]
    if not candidates:
        return 1
    for min_steps in (4, 2, 1):
        ok = [d for d in candidates if n // d >= min_steps]
        if ok:
            return max(ok)
    return 1


# --------------------------- fused path (common) ---------------------------

def _se_fused_kernel(x_ref, w1_ref, w2_ref, o_ref):
    """One grid step: Nb whole images in native NCHW (Nb, C, HW) layout."""
    x = x_ref[...]                                                   # (Nb, C, HW)
    inv_hw = 1.0 / x.shape[-1]
    # Squeeze: per-image channel means, one batched reduce, f32 accumulation.
    means = jnp.sum(x, axis=-1, dtype=jnp.float32) * inv_hw          # (Nb, C)
    # Excite: tiny MLP over the Nb images (latency-class dots; the kernel is
    # HBM-bound so the MXU/VPU have plenty of slack).
    w1 = w1_ref[...].astype(jnp.float32)                             # (C_mid, C)
    w2 = w2_ref[...].astype(jnp.float32)                             # (C, C_mid)
    h = jax.lax.dot_general(means, w1, (((1,), (1,)), ((), ())),
                            preferred_element_type=jnp.float32)      # (Nb, C_mid)
    h = jnp.maximum(h, 0.0)
    s = jax.lax.dot_general(h, w2, (((1,), (1,)), ((), ())),
                            preferred_element_type=jnp.float32)      # (Nb, C)
    s = jax.nn.sigmoid(s)
    # Scale: single broadcasted multiply + store (s broadcast over HW lanes).
    o_ref[...] = (x * s[:, :, None].astype(x.dtype)).astype(o_ref.dtype)


def _se_fused(x3, w1, w2, nb, vmem_limit):
    n, c, hw = x3.shape
    itemsize = jnp.dtype(x3.dtype).itemsize
    c_mid = int(w1.shape[0])
    w_bytes = int((w1.size + w2.size) * jnp.dtype(w1.dtype).itemsize)
    blk = (nb, c, hw)
    cost = pl.CostEstimate(
        flops=int(n * (2 * c * hw + 4 * c * c_mid)),
        transcendentals=int(n * c),
        bytes_accessed=int(2 * n * c * hw * itemsize + w_bytes),
    )
    return pl.pallas_call(
        _se_fused_kernel,
        out_shape=jax.ShapeDtypeStruct(x3.shape, x3.dtype),
        grid_spec=pltpu.PrefetchScalarGridSpec(
            num_scalar_prefetch=0,
            grid=(n // nb,),
            in_specs=[
                pl.BlockSpec(blk, lambda i: (i, 0, 0)),            # Nb images
                pl.BlockSpec(tuple(w1.shape), lambda i: (0, 0)),   # conv1 weight
                pl.BlockSpec(tuple(w2.shape), lambda i: (0, 0)),   # conv2 weight
            ],
            out_specs=pl.BlockSpec(blk, lambda i: (i, 0, 0)),
        ),
        compiler_params=pltpu.CompilerParams(
            dimension_semantics=("parallel",),
            vmem_limit_bytes=int(vmem_limit),
        ),
        cost_estimate=cost,
    )(x3, w1, w2)


# ----------------- streaming fallback (huge feature maps) ------------------

def _se_scale_kernel(x_ref, s_ref, o_ref):
    # (1, C, HW_tile) * (1, C, 1) broadcast over the lane (HW) axis.
    o_ref[...] = (x_ref[...] * s_ref[...]).astype(o_ref.dtype)


def _se_streaming(x3, w1, w2, budget, vmem_limit):
    """Two-pass path: XLA channel means + tiny excite, then a Pallas scale
    kernel streaming lane-aligned HW tiles (never exceeds the VMEM budget)."""
    n, c, hw = x3.shape
    itemsize = jnp.dtype(x3.dtype).itemsize
    means = jnp.mean(x3.astype(jnp.float32), axis=-1)                 # (N, C)
    h = jnp.maximum(means @ w1.astype(jnp.float32).T, 0.0)            # (N, C_mid)
    s = jax.nn.sigmoid(h @ w2.astype(jnp.float32).T)                  # (N, C)
    s3 = s.astype(x3.dtype).reshape(n, c, 1)

    usable = int(0.9 * budget)
    max_tile = max(1, usable // max(1, 4 * c * itemsize))
    if max_tile >= hw:
        tile_hw = hw
    else:
        tile_hw = min(max(128, (max_tile // 128) * 128), hw)
    grid = (n, pl.cdiv(hw, tile_hw))
    cost = pl.CostEstimate(
        flops=int(n * c * hw),
        transcendentals=0,
        bytes_accessed=int(2 * n * c * hw * itemsize),
    )
    return pl.pallas_call(
        _se_scale_kernel,
        out_shape=jax.ShapeDtypeStruct(x3.shape, x3.dtype),
        grid_spec=pltpu.PrefetchScalarGridSpec(
            num_scalar_prefetch=0,
            grid=grid,
            in_specs=[
                pl.BlockSpec((1, c, tile_hw), lambda i, t: (i, 0, t)),
                pl.BlockSpec((1, c, 1), lambda i, t: (i, 0, 0)),
            ],
            out_specs=pl.BlockSpec((1, c, tile_hw), lambda i, t: (i, 0, t)),
        ),
        compiler_params=pltpu.CompilerParams(
            dimension_semantics=("parallel", "parallel"),
            vmem_limit_bytes=int(vmem_limit),
        ),
        cost_estimate=cost,
    )(x3, s3)


# ------------------------------- public API --------------------------------

def se_block(x, w1, w2, *, vmem_budget_bytes=None):
    """SEBlock forward. x: (N, C, H, W); w1: (C_mid, C); w2: (C, C_mid)."""
    n, c, hgt, wid = x.shape
    hw = hgt * wid
    x3 = x.reshape(n, c, hw)                 # free (metadata-only) reshape
    itemsize = jnp.dtype(x.dtype).itemsize
    w_bytes = int((w1.size + w2.size) * jnp.dtype(w1.dtype).itemsize)

    vmem_limit = _vmem_budget_bytes()
    budget = int(vmem_budget_bytes) if vmem_budget_bytes is not None else vmem_limit

    img_bytes = c * hw * itemsize
    if 4 * img_bytes + 2 * w_bytes <= int(0.9 * budget):
        nb = _pick_batch_block(n, img_bytes, w_bytes, budget)
        out3 = _se_fused(x3, w1, w2, nb, vmem_limit)
    else:
        out3 = _se_streaming(x3, w1, w2, budget, vmem_limit)
    return out3.reshape(n, c, hgt, wid)


def se_block_ref(x, w1, w2):
    """Plain-JAX reference matching the PyTorch forward."""
    x0 = jnp.mean(x.astype(jnp.float32), axis=(2, 3), keepdims=True)
    x0 = jnp.einsum('oc,nchw->nohw', w1.astype(jnp.float32), x0)
    x0 = jax.nn.relu(x0)
    x0 = jnp.einsum('oc,nchw->nohw', w2.astype(jnp.float32), x0)
    x0 = jax.nn.sigmoid(x0).astype(x.dtype)
    return x * x0


if __name__ == "__main__":
    key = jax.random.PRNGKey(0)
    kx1, kx2, k1, k2 = jax.random.split(key, 4)

    reduction = 8
    C = 32
    C_mid = C // reduction  # 4

    # Deterministic synthetic 1x1-conv weights (no bias), kaiming-ish scale.
    w1 = jax.random.normal(k1, (C_mid, C), dtype=jnp.float32) * (2.0 / C) ** 0.5
    w2 = jax.random.normal(k2, (C, C_mid), dtype=jnp.float32) * (2.0 / C_mid) ** 0.5

    ok = True

    # Case 1: N=2, HW=256 (lane-aligned) -> fused path, Nb=1, 2 grid steps.
    x1 = jax.random.normal(kx1, (2, C, 16, 16), dtype=jnp.float32)
    out1 = jax.block_until_ready(se_block(x1, w1, w2))
    ok = ok and bool(jnp.allclose(out1, se_block_ref(x1, w1, w2),
                                  atol=1e-5, rtol=1e-5))

    # Case 2: N=8, HW=49 (not lane-aligned) -> fused path, Nb=2 (batched
    # squeeze/excite/scale), masked stores, no wrapper transposes.
    x2 = jax.random.normal(kx2, (8, C, 7, 7), dtype=jnp.float32)
    out2 = jax.block_until_ready(se_block(x2, w1, w2))
    ok = ok and bool(jnp.allclose(out2, se_block_ref(x2, w1, w2),
                                  atol=1e-5, rtol=1e-5))

    # Case 3: force the large-feature-map streaming fallback with a tiny
    # sizing budget (exercises the two-pass path on small shapes).
    out3 = jax.block_until_ready(se_block(x1, w1, w2,
                                          vmem_budget_bytes=64 * 1024))
    ok = ok and bool(jnp.allclose(out3, se_block_ref(x1, w1, w2),
                                  atol=1e-5, rtol=1e-5))

    assert ok, "mismatch vs reference"
    print("KERNEL_OK")
</pallas_src>

<mosaic_0001>
module attributes {stable_mosaic.version = 11 : i64} {
  func.func @_se_fused_kernel(%arg0: i32, %arg1: memref<1x32x256xf32, #tpu.memory_space<vmem>>, %arg2: memref<4x32xf32, #tpu.memory_space<vmem>>, %arg3: memref<32x4xf32, #tpu.memory_space<vmem>>, %arg4: memref<1x32x256xf32, #tpu.memory_space<vmem>>) attributes {dimension_semantics = [#tpu.dimension_semantics<parallel>], iteration_bounds = array<i64: 2>, scalar_prefetch = 0 : i64, scratch_operands = 0 : i64, tpu.core_type = #tpu.core_type<tc>, window_params = [{transform_indices = @transform_0, window_bounds = array<i64: 1, 32, 256>}, {pipeline_mode = #tpu.pipeline_mode<synchronous>, transform_indices = @transform_1, window_bounds = array<i64: 4, 32>}, {pipeline_mode = #tpu.pipeline_mode<synchronous>, transform_indices = @transform_2, window_bounds = array<i64: 32, 4>}, {transform_indices = @transform_3, window_bounds = array<i64: 1, 32, 256>}]} {
    %c0 = arith.constant 0 : index
    %c0_0 = arith.constant 0 : index
    %c0_1 = arith.constant 0 : index
    %0 = vector.load %arg1[%c0, %c0_0, %c0_1] : memref<1x32x256xf32, #tpu.memory_space<vmem>>, vector<1x32x256xf32>
    %cst = arith.constant dense<0.000000e+00> : vector<1x32xf32>
    %1 = vector.multi_reduction <add>, %0, %cst [2] : vector<1x32x256xf32> to vector<1x32xf32>
    %cst_2 = arith.constant 3.906250e-03 : f32
    %2 = vector.broadcast %cst_2 : f32 to vector<1x32xf32>
    %3 = arith.mulf %1, %2 : vector<1x32xf32>
    %c0_3 = arith.constant 0 : index
    %c0_4 = arith.constant 0 : index
    %4 = vector.load %arg2[%c0_3, %c0_4] : memref<4x32xf32, #tpu.memory_space<vmem>>, vector<4x32xf32>
    %c0_5 = arith.constant 0 : index
    %c0_6 = arith.constant 0 : index
    %5 = vector.load %arg3[%c0_5, %c0_6] : memref<32x4xf32, #tpu.memory_space<vmem>>, vector<32x4xf32>
    %cst_7 = arith.constant dense<0.000000e+00> : vector<1x4xf32>
    %6 = tpu.matmul %3, %4, %cst_7 {dimension_numbers = #tpu.dot_dimension_numbers<[1], [1], [0], [0], [0, 0, 1, 0], [], []>} : vector<1x32xf32>, vector<4x32xf32>, vector<1x4xf32> -> vector<1x4xf32>
    %cst_8 = arith.constant 0.000000e+00 : f32
    %7 = vector.broadcast %cst_8 : f32 to vector<1x4xf32>
    %8 = arith.maximumf %6, %7 : vector<1x4xf32>
    %cst_9 = arith.constant dense<0.000000e+00> : vector<1x32xf32>
    %9 = tpu.matmul %8, %5, %cst_9 {dimension_numbers = #tpu.dot_dimension_numbers<[1], [1], [0], [0], [0, 0, 1, 0], [], []>} : vector<1x4xf32>, vector<32x4xf32>, vector<1x32xf32> -> vector<1x32xf32>
    %10 = arith.negf %9 : vector<1x32xf32>
    %11 = math.exp %10 : vector<1x32xf32>
    %cst_10 = arith.constant 1.000000e+00 : f32
    %12 = vector.broadcast %cst_10 : f32 to vector<1x32xf32>
    %13 = arith.addf %12, %11 : vector<1x32xf32>
    %14 = arith.divf %12, %13 : vector<1x32xf32>
    %15 = vector.shape_cast %14 : vector<1x32xf32> to vector<1x32x1xf32>
    %16 = vector.broadcast %15 : vector<1x32x1xf32> to vector<1x32x256xf32>
    %17 = arith.mulf %0, %16 : vector<1x32x256xf32>
    %c0_11 = arith.constant 0 : index
    %c0_12 = arith.constant 0 : index
    %c0_13 = arith.constant 0 : index
    %18 = vector.load %arg4[%c0_11, %c0_12, %c0_13] : memref<1x32x256xf32, #tpu.memory_space<vmem>>, vector<1x32x256xf32>
    tpu.vector_store %arg4[%c0_11, %c0_12, %c0_13], %17 {strides = array<i32>} : memref<1x32x256xf32, #tpu.memory_space<vmem>>, vector<1x32x256xf32>,
    return
  }
  func.func @transform_0(%arg0: i32) -> (i32, i32, i32) {
    %c0_i32 = arith.constant 0 : i32
    %c0_i32_0 = arith.constant 0 : i32
    %c0_i32_1 = arith.constant 0 : i32
    return %arg0, %c0_i32, %c0_i32_0 : i32, i32, i32
  }
  func.func @transform_1(%arg0: i32) -> (i32, i32) {
    %c0_i32 = arith.constant 0 : i32
    %c0_i32_0 = arith.constant 0 : i32
    %c0_i32_1 = arith.constant 0 : i32
    return %c0_i32, %c0_i32_0 : i32, i32
  }
  func.func @transform_2(%arg0: i32) -> (i32, i32) {
    %c0_i32 = arith.constant 0 : i32
    %c0_i32_0 = arith.constant 0 : i32
    %c0_i32_1 = arith.constant 0 : i32
    return %c0_i32, %c0_i32_0 : i32, i32
  }
  func.func @transform_3(%arg0: i32) -> (i32, i32, i32) {
    %c0_i32 = arith.constant 0 : i32
    %c0_i32_0 = arith.constant 0 : i32
    %c0_i32_1 = arith.constant 0 : i32
    return %arg0, %c0_i32, %c0_i32_0 : i32, i32, i32
  }
}

</mosaic_0001>

<bundles_post_ra>
// kernel: tpu_custom_call.1
= control target key start
LH: loop header
LB: loop body
LE: loop exit
PB: predicated region body
PF: predicated region fallthrough
CT: control target
= control target key end

     0   :  { %8 = vsyncpa [#allocation3], 0  ;;  %s997_s0 = inlined_call_operand.hbm [shape: f32[2,32,256], index: 0, kind: input, shape index: {}]   ;;  %s998_s1 = inlined_call_operand.vmem [shape: f32[4,32], index: 1, kind: input, shape index: {}]   ;;  %s999_s2 = inlined_call_operand.vmem [shape: f32[32,4], index: 2, kind: input, shape index: {}]   ;;  %s1000_s3 = inlined_call_operand.hbm [shape: f32[2,32,256], index: 3, kind: output, shape index: {}]  }
   0x1   :  { %10 = vsyncpa [#allocation3 + $0x1], 0 }
   0x2   :  { %11 = vsyncpa [#allocation4], 0 }
   0x3   :  { %13 = vsyncpa [#allocation4 + $0x1], 0  ;;  %s779_s12 = smov 0   ;;  %s781_s13 = smov 0  }
   0x4   :  { %s783_s14 = smov 0   ;;  %s785_s15 = smov 0  }
   0x5 LB: > { %s800_s16 = sadd.s32 4294967295, %s748_s15   ;;  %s540_s17 = sadd.s32 4294967294, %s748_s15   ;;  %s748_s15 = sphi %s785_s15, %s1013_s15   ;;  %s744_s14 = sphi %s783_s14, %s1012_s14   ;;  %s740_s13 = sphi %s781_s13, %s1011_s13   ;;  %s736_s12 = sphi %s779_s12, %s1010_s12  }
   0x6   : > { %s804_s18 = sadd.s32 1, %s748_s15   ;;  %s26_s19 = sadd.s32 1, %s744_s14 }
   0x7   : > { %s23_s20 = ssub.s32 %s748_s15, %s804_s18  ;;  %p33_p0 = scmp.ne.s32.totalorder %s744_s14, %s740_s13 }
   0x8   : > { %p24_p1 = scmp.eq.s32.totalorder %s23_s20, 0  ;;  %p34_p2 = scmp.eq.s32.totalorder %s748_s15, 0 }
   0x9   : > { %p39_p3 = scmp.ne.s32.totalorder %s740_s13, %s736_s12  ;;  %p40_p4 = scmp.eq.s32.totalorder %s800_s16, 0 }
   0xa   : > { %s816_s21 = scalar_select %p24_p1, %s744_s14, %s26_s19  }
   0xb   : > { %p818_p5 = por %p34_p2, %p33_p0  ;;  %p822_p6 = por %p40_p4, %p39_p3 }
   0xc   : > { %p105_p7 = scmp.eq.s32.totalorder %s800_s16, 1  ;;  %p111_p8 = scmp.eq.s32.totalorder %s540_s17, 1 }
   0xd   : > { %p607_p10 = scmp.lt.s32.totalorder %s748_s15, 2  ;;  %s137_s26 = sand.u32 1, %s744_s14  }
   0xe   : > { %p829_p11 = por %p105_p7, %p33_p0  ;;  %p833_p12 = por %p111_p8, %p39_p3 }
   0xf   : > { %s562_s27 = sshll.u32 %s748_s15, 10  ;;  %s543_s28 = sshll.u32 %s137_s26, 6 }
  0x10   : > { %s1004_s24 = scalar_select %p829_p11, 1, 0 }
  0x11   : > { %s1005_s25 = scalar_select %p833_p12, 1, 0 }
  0x12   : > { %s842_s4 = scalar_lea.hbm %s997_s0, %s562_s27  ;;  %s141_s5 = scalar_lea.vmem [#allocation2], %s543_s28 }
  0x13   : > { %s148_s6 = sshll.u32 %s141_s5, 4  ;;  %p846_p13 = pnand %p607_p10, %p818_p5  ;;  %s850_s6 = int_to_ptr.vmem [resolvable:$true] %s148_s6 }
  0x14   : > { %s852_s8 = scalar_lea.sflag [#allocation3], %s137_s26  ;;  %s652_s9 = scalar_lea.hbm %s842_s4, 1024 }
  0x15   : > { %p653_p0 = scmp.ne.s32.totalorder %s842_s4, %s652_s9  ;;  %p654_p1 = pneg %p846_p13 }
  0x16   : > { %s657_s17 = scalar_lea.hbm %s997_s0, 2048  ;;  %p658_p4 = scmp.lt.u32.totalorder %s842_s4, %s997_s0 }
  0x17   : > { %p655_p2 = pnand %p654_p1, %p653_p0  ;;  %p659_p5 = scmp.lt.u32.totalorder %s657_s17, %s652_s9 }
  0x18   : > { %p661_p8 = scmp.lt.u32.totalorder %s652_s9, %s842_s4 }
  0x19   : > { %p656_p3 = pneg %p655_p2  ;;  %p660_p7 = por %p659_p5, %p658_p4 }
  0x1b   : > { %p662_p10 = por %p661_p8, %p660_p7 }
  0x1d   : > { %p663_p9 = pnand %p662_p10, %p656_p3 }
  0x1f   : > { %666 = shalt.err (!%p663_p9)
}
  0x20   : > { %s667_s22 = scalar_lea.vmem %s850_s6, 1024  ;;  %s750_s26 = smov [#allocation2]  }
  0x21   : > { %p668_p0 = scmp.ne.s32.totalorder %s850_s6, %s667_s22  ;;  %s672_s27 = sshll.u32 %s750_s26, 4  ;;  %s673_s27 = int_to_ptr.vmem [resolvable:$false] %s672_s27 }
  0x22   : > { %s674_s28 = scalar_lea.vmem %s673_s27, 2048  ;;  %p675_p11 = scmp.lt.s32.totalorder %s850_s6, %s673_s27 }
  0x23   : > { %p670_p2 = pnand %p668_p0, %p654_p1  ;;  %p676_p4 = scmp.lt.s32.totalorder %s674_s28, %s667_s22 }
  0x25   : > { %p671_p12 = pneg %p670_p2  ;;  %p677_p5 = por %p676_p4, %p675_p11 }
  0x27   : > { %p678_p7 = pnand %p677_p5, %p671_p12 }
  0x29   : > { %681 = shalt.err (!%p678_p7)
}
  0x2a   : > { %s751_s29 = smov 256   ;;  %s752_s30 = smov 16  }
  0x2b   : > { %602 = dma.hbm_to_vmem [thread:$0]  (!%p846_p13), %s842_s4, 1024, %s850_s6, %s852_s8, %s751_s29, %s751_s29, %s752_s30  }
  0x2c   : > { %p546_p9 = scmp.ge.s32.totalorder %s748_s15, 1  ;;  %p156_p1 = scmp.lt.s32.totalorder %s748_s15, 3 }
  0x2e   : > { %p157_p3 = pnand %p546_p9, %p156_p1 }
  0x2f   : > { %s883_s5 = sand.u32 (!%p157_p3), 1, %s740_s13  }
  0x30   : > { %160 = sbr.rel (%p157_p3) target bundleno = 806 (0x326), region = 32  ;;  %s547_s9 = sshll.u32 (!%p157_p3), %s883_s5, 6 }
  0x31   : > { %s163_s10 = scalar_lea.sflag (!%p157_p3), [#allocation3], %s883_s5  ;;  %s166_s11 = scalar_lea.vmem (!%p157_p3), [#allocation2], %s547_s9 }
  0x37   : > { %727 = dma.done.wait (%p822_p6), %s163_s10, 1024  }
  0x38   : > { %729 = vsyncadd (%p822_p6), %s163_s10, 4294966272  ;;  %v893_v0 = vld [vmem:[%s166_s11] sm:$0xff]  ;;  %v895_v1 = vld [vmem:[%s166_s11 + $0x8] sm:$0xff]  ;;  %v753_v12 = vmov 0.0   ;;  %vm249_vm0 = vcmask 261120   ;;  %vm754_vm1 = vmmov 0   ;;  %v222_v21 = vlaneseq }
  0x39   : > { %v897_v2 = vld [vmem:[%s166_s11 + $0x20] sm:$0xff]  ;;  %v197_v3 = vadd.f32 %v895_v1, %v893_v0  ;;  %v901_v4 = vld [vmem:[%s166_s11 + $0x28] sm:$0xff]  ;;  %v903_v5 = vld [vmem:[%s166_s11 + $0x10] sm:$0xff]  ;;  %571 = vmatprep.subr.mxu0 %v753_v12  ;;  %573 = vmatprep.mubr.msk.f32.mxu0 %vm754_vm1, %v753_v12  ;;  %vm326_vm2 = vcmask 31744   ;;  %v755_v16 = vmov 0.0|0.0   ;;  %vm233_vm4 = vcmask 130112  }
  0x3a   : > { %v905_v6 = vld [vmem:[%s166_s11 + $0x18] sm:$0xff]  ;;  %v203_v7 = vadd.f32 %v901_v4, %v897_v2  ;;  %v909_v8 = vld [vmem:[%s166_s11 + $0x30] sm:$0xff]  ;;  %v213_v13 = vld [vmem:[%s998_s1] sm:$0xf]  ;;  %584 = vmatprep.mubr.msk.f32.mxu1 %vm754_vm1, %v753_v12  ;;  %587 = vmatprep.subr.bf16.mxu1 %v755_v16  ;;  %v223_v22 = vand.u32 127, %v222_v21  ;;  %v225_v23 = vshrl.u32 %v222_v21, 7 }
  0x3b   : > { %v911_v9 = vld [vmem:[%s166_s11 + $0x38] sm:$0xff]  ;;  %198 = vadd.xlane.f32.xlu0 %v197_v3  ;;  %v200_v10 = vadd.f32 %v905_v6, %v903_v5  ;;  %572 = vmatpush3.xpose.msk.msra.mxu0 %vm249_vm0, %v213_v13  ;;  %v214_v14 = vld [vmem:[%s999_s2] sm:$0xff]  ;;  %v215_v15 = vld [vmem:[%s999_s2 + $0x8] sm:$0xff]  ;;  %vm240_vm5 = vcmask 195712   ;;  %vm247_vm6 = vcmask 261312   ;;  %s188_s27 = scalar_lea.vmem [#allocation5], %s547_s9 }
  0x3c   : > { %204 = vadd.xlane.f32.xlu1 %v203_v7  ;;  %v206_v11 = vadd.f32 %v911_v9, %v909_v8  ;;  %v588_v17 = vpack.c.bf16 %v215_v15, %v214_v14  ;;  %vm589_vm3 = vmpackc.low %vm326_vm2, %vm326_vm2  ;;  %v216_v18 = vld [vmem:[%s999_s2 + $0x10] sm:$0xff]  ;;  %v217_v19 = vld [vmem:[%s999_s2 + $0x18] sm:$0xff]  ;;  %v228_v24 = vadd.s32 4294967288, %v223_v22  ;;  %v235_v26 = vadd.s32 4294967280, %v223_v22  ;;  %s467_s28 = sshll.u32 %s188_s27, 4  ;;  %s563_s29 = sshll.u32 %s800_s16, 10  ;;  %s946_s28 = int_to_ptr.vmem [resolvable:$true] %s467_s28 }
  0x3d   : > { %v592_v20 = vpack.c.bf16 %v217_v19, %v216_v18  ;;  %v242_v27 = vadd.s32 4294967272, %v223_v22  ;;  %v226_v29 = vsub.s32 %v223_v22, %v225_v23  ;;  %v420_v54 = vsub.s32 0, %v225_v23  ;;  %s951_s10 = scalar_lea.hbm %s1000_s3, %s563_s29  ;;  %s454_s16 = scalar_lea.sflag [#allocation4], %s883_s5 }
  0x3e   : > { %590 = vmatpush3.bf16.xpose.msk.msra.mxu1 %vm589_vm3, %v588_v17  ;;  %v231_v31 = vsub.s32 %v228_v24, %v225_v23  ;;  %v238_v32 = vsub.s32 %v235_v26, %v225_v23  ;;  %s682_s11 = scalar_lea.vmem %s946_s28, 1024  ;;  %p1007_p11 = scmp.ne.s32.totalorder %s1004_s24, 0 }
  0x3f   : > { %201 = vadd.xlane.f32.xlu0 %v200_v10  ;;  %591 = vmatprep.subr.bf16.mxu1 %v755_v16  ;;  %v245_v35 = vsub.s32 %v242_v27, %v225_v23  ;;  %p683_p6 = scmp.ne.s32.totalorder %s946_s28, %s682_s11  ;;  %s756_s23 = smov [#allocation5]  }
  0x40   : > { %207 = vadd.xlane.f32.xlu1 %v206_v11  ;;  %s686_s4 = sshll.u32 %s756_s23, 4  ;;  %s687_s4 = int_to_ptr.vmem [resolvable:$false] %s686_s4 }
  0x41   : > { %p684_p12 = pnand %p683_p6, %p1007_p11  ;;  %s688_s6 = scalar_lea.vmem %s687_s4, 2048 }
  0x42   : > { %p689_p8 = scmp.lt.s32.totalorder %s946_s28, %s687_s4  ;;  %p690_p10 = scmp.lt.s32.totalorder %s688_s6, %s682_s11 }
  0x43   : > { %p685_p13 = pneg %p684_p12 }
  0x44   : > { %p691_p0 = por %p690_p10, %p689_p8 }
  0x46   : > { %594 = vmatpush3.bf16.xpose.msk.msra.mxu1 %vm589_vm3, %v592_v20  ;;  %p692_p2 = pnand %p691_p0, %p685_p13 }
  0xc8   : > { %v199_v25 = vpop.xlane.xlu0 %198 }
  0xc9   : > { %v205_v28 = vpop.xlane.xlu1 %204  ;;  %v209_v30 = vmul.f32 0.00390625, %v199_v25 }
  0xca   : > { %v211_v33 = vmul.f32 0.00390625, %v205_v28 }
  0xcb   : > { %v227_v39 = vrot.slane %v209_v30, %v226_v29 }
  0xcc   : > { %v202_v34 = vpop.xlane.xlu0 %201  ;;  %v239_v41 = vrot.slane %v211_v33, %v238_v32 }
  0xcd   : > { %v210_v36 = vmul.f32 0.00390625, %v202_v34  ;;  %v208_v37 = vpop.xlane.xlu1 %207 }
  0xce   : > { %v212_v38 = vmul.f32 0.00390625, %v208_v37 }
  0xcf   : > { %v232_v40 = vrot.slane %v210_v36, %v231_v31 }
  0xd0   : > { %v246_v42 = vrot.slane %v212_v38, %v245_v35 }
  0xd1   : > { %v234_v43 = vsel %vm233_vm4, %v232_v40, %v227_v39 }
  0xd2   : > { %v241_v44 = vsel %vm240_vm5, %v239_v41, %v234_v43 }
  0xd3   : > { %v248_v45 = vsel %vm247_vm6, %v246_v42, %v241_v44 }
  0xd4   : > { %574 = vmatmul.mubr.msk.f32.vlgmr.msra.gmra.mrb[0].mxu0 %vm249_vm0, %v248_v45 }
 0x1a7   : > { %v321_v46 = vpop.f32.mrb[0].mxu0 }
 0x1a8   : > { %v325_v47 = vmax.f32 %v321_v46, 0.0  ;;  %v575_v48 = vpop.f32.mrb[1].mxu0 }
 0x1aa   : > { %585 = vmatmul.mubr.msk.f32.vlgmr.msra.gmra.mrb[0].mxu1 %vm326_vm2, %v325_v47 }
 0x27d   : > { %v408_v49 = vpop.f32.mrb[0].mxu1 }
 0x27e   : > { %v556_v50 = vmul.f32 -1.442695, %v408_v49  ;;  %v586_v51 = vpop.f32.mrb[1].mxu1 }
 0x280   : > { %648 = vpow2.f32 %v556_v50 }
 0x28a   : > { %v649_v52 = vpop.eup %648 }
 0x28b   : > { %v415_v53 = vadd.f32 1.0, %v649_v52 }
 0x28d   : > { %650 = vrcp.f32 %v415_v53 }
 0x297   : > { %v651_v55 = vpop.eup %650 }
 0x298   : > { %v421_v56 = vrot.slane %v651_v55, %v420_v54 }
 0x29a   : > { %427 = vbcast.lane.b32.xlu1 %v421_v56, 264  ;;  %423 = vbcast.lane.b32.xlu0 %v421_v56, 256 }
 0x29e   : > { %431 = vbcast.lane.b32.xlu1 %v421_v56, 272 }
 0x2a2   : > { %435 = vbcast.lane.b32.xlu1 %v421_v56, 280 }
 0x30c   : > { %v428_v57 = vpop.permute.xlu1 %427  ;;  %v424_v58 = vpop.permute.xlu0 %423 }
 0x30d   : > { %v439_v59 = vmul.f32 %v428_v57, %v903_v5  ;;  %v440_v60 = vmul.f32 %v428_v57, %v905_v6  ;;  %v437_v61 = vmul.f32 %v424_v58, %v893_v0  ;;  %v438_v62 = vmul.f32 %v424_v58, %v895_v1 }
 0x30f   : > { %447 = vst [vmem:[%s188_s27 + $0x10] sm:$0xff] %v439_v59  ;;  %448 = vst [vmem:[%s188_s27 + $0x18] sm:$0xff] %v440_v60 }
 0x310   : > { %445 = vst [vmem:[%s188_s27] sm:$0xff] %v437_v61  ;;  %446 = vst [vmem:[%s188_s27 + $0x8] sm:$0xff] %v438_v62  ;;  %v432_v63 = vpop.permute.xlu1 %431 }
 0x311   : > { %v441_v3 = vmul.f32 %v432_v63, %v897_v2  ;;  %v442_v5 = vmul.f32 %v432_v63, %v901_v4 }
 0x313   : > { %449 = vst [vmem:[%s188_s27 + $0x20] sm:$0xff] %v441_v3  ;;  %450 = vst [vmem:[%s188_s27 + $0x28] sm:$0xff] %v442_v5 }
 0x314   : > { %v436_v0 = vpop.permute.xlu1 %435 }
 0x315   : > { %v443_v1 = vmul.f32 %v436_v0, %v909_v8  ;;  %v444_v2 = vmul.f32 %v436_v0, %v911_v9 }
 0x317   : > { %451 = vst [vmem:[%s188_s27 + $0x30] sm:$0xff] %v443_v1  ;;  %452 = vst [vmem:[%s188_s27 + $0x38] sm:$0xff] %v444_v2 }
 0x318   : > { %695 = shalt.err (!%p692_p2)
}
 0x319   : > { %s696_s7 = scalar_lea.hbm %s951_s10, 1024  ;;  %s700_s19 = scalar_lea.hbm %s1000_s3, 2048 }
 0x31a   : > { %p697_p4 = scmp.ne.s32.totalorder %s951_s10, %s696_s7  ;;  %p701_p9 = scmp.lt.u32.totalorder %s951_s10, %s1000_s3 }
 0x31b   : > { %p702_p1 = scmp.lt.u32.totalorder %s700_s19, %s696_s7  ;;  %p704_p6 = scmp.lt.u32.totalorder %s696_s7, %s951_s10 }
 0x31c   : > { %p698_p5 = pnand %p697_p4, %p1007_p11 }
 0x31d   : > { %p703_p3 = por %p702_p1, %p701_p9 }
 0x31e   : > { %p699_p7 = pneg %p698_p5 }
 0x31f   : > { %p705_p12 = por %p704_p6, %p703_p3 }
 0x321   : > { %p706_p13 = pnand %p705_p12, %p699_p7 }
 0x323   : > { %709 = shalt.err (!%p706_p13)
}
 0x324   : > { %s757_s26 = smov 256   ;;  %s758_s27 = smov 16  }
 0x325   : > { %597 = dma.vmem_to_hbm [thread:$0]  (%p1007_p11), %s946_s28, 1024, %s951_s10, %s454_s16, %s757_s26, %s757_s26, %s758_s27  }
 0x326 PF: > { %s482_s29 = sand.u32 1, %s736_s12   ;;  %p1008_p8 = scmp.ne.s32.totalorder %s1005_s25, 0 }
 0x327   : > { %p1009_p10 = scmp.ge.s32.totalorder %s748_s15, 2  ;;  %s483_s30 = scalar_lea.sflag [#allocation4], %s482_s29 }
 0x329   : > { %p604_p0 = pnand %p1009_p10, %p1008_p8 }
 0x32b   : > { %731 = dma.done.wait (!%p604_p0), %s483_s30, 1024  }
 0x32c   : > { %733 = vsyncadd (!%p604_p0), %s483_s30, 4294966272  ;;  %p16_p2 = scmp.ge.s32.totalorder %s804_s18, 4   ;;  %s1010_s12 = smov %s740_s13 }
 0x32d   : > { %s1011_s13 = smov %s744_s14  ;;  %s1012_s14 = smov %s816_s21 }
 0x32e   : > { %s1013_s15 = smov %s804_s18  ;;  %18 = sbr.rel (!%p16_p2) target bundleno = 5 (0x5), region = 77 }
 0x335   :  { %488 = vsyncpa [#allocation3], 1 }
 0x336   :  { %490 = vsyncpa [#allocation3 + $0x1], 1 }
 0x337   :  { %491 = vsyncpa [#allocation4], 1 }
 0x338   :  { %493 = vsyncpa [#allocation4 + $0x1], 1 }

</bundles_post_ra>
